<compile_context>
chip_gen: v5e
topology: v5e:2x2
jax: 0.10.0
libtpu: 0.0.40
codegen_flags: <defaults>
</compile_context>

<pallas_src>
import functools
import math

import jax
import jax.numpy as jnp
from jax import lax
from jax.experimental import pallas as pl
from jax.experimental.pallas import tpu as pltpu


# ----------------------------- helpers ---------------------------------------


def _pick_tile(dim, target, align):
    """Largest multiple of `align` that evenly divides `dim` and is <= target.

    Falls back to the full extent (always a legal block shape).
    # TODO(synk): pad awkward sequence lengths to a tile multiple instead of
    # falling back to the full extent (full-extent blocks defeat pipelining).
    """
    if dim <= target:
        return dim
    t = (target // align) * align
    while t >= align:
        if dim % t == 0:
            return t
        t -= align
    return dim


def _vmem_budget_and_targets():
    """(vmem_limit_bytes, tq_target, tkv_target) tuned per TPU generation."""
    cap = None
    try:
        cap = getattr(pltpu.get_tpu_info(), "vmem_capacity_bytes", None)
    except Exception:
        cap = None
    if cap is None:
        cap = 64 << 20                       # assume the smallest (v7x) if unknown
    if cap >= (96 << 20):                    # v5e / v6e: 128 MiB physical VMEM
        return min(100 << 20, (cap * 3) // 4), 512, 512
    return 48 << 20, 256, 512                # v7x: 64 MiB physical VMEM


def _attn_footprint(tq, tkv, embed, heads, head_dim, hm, has_mask, itemsize):
    """Rough VMEM bytes for the attention pipeline (double-buffered blocks)."""
    buf = 2 * (tq * embed + 2 * tkv * embed + tq * embed) * itemsize  # q,k,v,out
    if has_mask:
        buf += 2 * hm * tq * tkv                                      # int8 mask
    # f32 scratch; m/l lane-padded to 128, acc at least 128 lanes.
    buf += heads * tq * (2 * 128 + max(head_dim, 128)) * 4
    return buf


# ----------------------------- kernels ----------------------------------------


def _proj_kernel(x_ref, w_ref, o_ref):
    """y = x @ W (weight pre-transposed, optional scale pre-folded)."""
    o_ref[...] = jnp.dot(x_ref[...], w_ref[...],
                         preferred_element_type=jnp.float32).astype(o_ref.dtype)


def _attn_kernel(kv_hi_ref, *refs, heads, head_dim, per_head_mask, has_mask,
                 approx_recip, compute_dtype):
    """Online-softmax (flash) attention over pre-projected Q/K/V.

    Block views: q_ref (tq, E), k_ref/v_ref (tkv, E), mask_ref (Hm, tq, tkv)
    int8, o_ref (tq, E).  Grid: (batch, q_tiles, kv_tiles), kv innermost
    ("arbitrary").  kv_hi_ref[qi] = last kv tile with any unmasked entry.
    """
    if has_mask:
        mask_ref, q_ref, k_ref, v_ref, o_ref, m_sc, l_sc, acc_sc = refs
    else:
        q_ref, k_ref, v_ref, o_ref, m_sc, l_sc, acc_sc = refs
        mask_ref = None

    qi = pl.program_id(1)
    ki = pl.program_id(2)
    neg_big = jnp.float32(-1e20)

    @pl.when(ki == 0)
    def _init():
        m_sc[...] = jnp.full_like(m_sc, -jnp.inf)
        l_sc[...] = jnp.zeros_like(l_sc)
        acc_sc[...] = jnp.zeros_like(acc_sc)

    # Skip kv tiles that are fully masked for every batch/head (block sparsity).
    @pl.when(ki <= kv_hi_ref[qi])
    def _compute():
        q = q_ref[...]            # (tq, E), already projected + 1/sqrt(E) scaled
        k = k_ref[...]            # (tkv, E), already projected
        v = v_ref[...]            # (tkv, E), already projected
        # TODO(synk): roll this loop into lax.fori_loop for heads >= 16 to bound
        # code size / vreg pressure; unrolled is best for small head counts.
        for h in range(heads):
            sl = slice(h * head_dim, (h + 1) * head_dim)
            # energy_h = q_h @ k_h^T  -- contract last axes, no transpose.
            s = lax.dot_general(
                q[:, sl], k[:, sl],
                dimension_numbers=(((1,), (1,)), ((), ())),
                preferred_element_type=jnp.float32)                # (tq, tkv) f32
            if has_mask:
                mh = mask_ref[h] if per_head_mask else mask_ref[0]  # (tq, tkv) i8
                s = jnp.where(mh == 0, neg_big, s)

            m_prev = m_sc[h]                                        # (tq, 1)
            m_new = jnp.maximum(m_prev, jnp.max(s, axis=-1, keepdims=True))
            alpha = jnp.exp(m_prev - m_new)
            p = jnp.exp(s - m_new)
            l_sc[h] = alpha * l_sc[h] + jnp.sum(p, axis=-1, keepdims=True)
            acc_sc[h] = alpha * acc_sc[h] + jnp.dot(
                p.astype(compute_dtype), v[:, sl],
                preferred_element_type=jnp.float32)                 # (tq, hd) f32
            m_sc[h] = m_new

    @pl.when(ki == pl.num_programs(2) - 1)
    def _finalize():
        pieces = [acc_sc[h] * pl.reciprocal(l_sc[h], approx=approx_recip)
                  for h in range(heads)]
        # Single lane-dense store, already in (q, heads*head_dim) layout.
        o_ref[...] = jnp.concatenate(pieces, axis=-1).astype(o_ref.dtype)


def _fc_kernel(x_ref, w_ref, b_ref, o_ref, acc_ref):
    """Tiled y = x @ W^T + b (W pre-transposed in the wrapper)."""
    @pl.when(pl.program_id(2) == 0)
    def _():
        acc_ref[...] = jnp.zeros_like(acc_ref)

    acc_ref[...] += jnp.dot(x_ref[...], w_ref[...],
                            preferred_element_type=jnp.float32)

    @pl.when(pl.program_id(2) == pl.num_programs(2) - 1)
    def _():
        o_ref[...] = (acc_ref[...] + b_ref[...]).astype(o_ref.dtype)


# ----------------------------- wrapper ----------------------------------------


def _project_heads(x, w, heads, head_dim, vmem_limit, *, scale=None,
                   compute_dtype=jnp.bfloat16):
    """Apply the shared per-head Linear(head_dim, head_dim) to x (N, L, E).

    One ordinary (N*L*heads, hd) @ (hd, hd) matmul (PyTorch Linear is x @ W.T);
    no block-diagonal zeros, no per-q-tile recomputation in the flash kernel.
    """
    N, L, E = x.shape
    w_t = w.T.astype(jnp.float32)
    if scale is not None:
        w_t = w_t * scale
    w_t = w_t.astype(compute_dtype)

    rows = N * L * heads
    x2 = x.reshape(rows, head_dim).astype(compute_dtype)
    tm = _pick_tile(rows, 1024, 8)

    y = pl.pallas_call(
        _proj_kernel,
        out_shape=jax.ShapeDtypeStruct((rows, head_dim), compute_dtype),
        grid_spec=pltpu.PrefetchScalarGridSpec(
            num_scalar_prefetch=0,
            grid=(rows // tm,),
            in_specs=[pl.BlockSpec((tm, head_dim), lambda i: (i, 0)),
                      pl.BlockSpec((head_dim, head_dim), lambda i: (0, 0))],
            out_specs=pl.BlockSpec((tm, head_dim), lambda i: (i, 0))),
        compiler_params=pltpu.CompilerParams(
            dimension_semantics=("parallel",),
            vmem_limit_bytes=vmem_limit),
    )(x2, w_t)
    return y.reshape(N, L, E)


def self_attention(values, keys, query, mask, params, *, embed_size, heads,
                   compute_dtype=jnp.bfloat16):
    """Pallas equivalent of selfAttention.forward.

    values/keys/query: (N, seq_len, embed_size) float32
    mask: None or broadcastable to (N, heads, q_len, k_len); ==0 means masked.
    compute_dtype: MXU operand dtype (bf16 default); softmax/accum stay f32.
    """
    wq, wk, wv, w_out, b_out = params
    N, v_len, _ = values.shape
    k_len = keys.shape[1]
    q_len = query.shape[1]
    head_dim = embed_size // heads
    assert head_dim * heads == embed_size, "embed size needs to be div by heads"
    assert k_len == v_len

    vmem_limit, tq_target, tkv_target = _vmem_budget_and_targets()
    itemsize = jnp.dtype(compute_dtype).itemsize
    approx_recip = jnp.dtype(compute_dtype) != jnp.dtype(jnp.float32)

    scale = jnp.float32(1.0 / math.sqrt(float(embed_size)))

    # ---- hoisted per-head projections (q also carries the softmax scale) ----
    q_p = _project_heads(query, wq, heads, head_dim, vmem_limit,
                         scale=scale, compute_dtype=compute_dtype)
    k_p = _project_heads(keys, wk, heads, head_dim, vmem_limit,
                         compute_dtype=compute_dtype)
    v_p = _project_heads(values, wv, heads, head_dim, vmem_limit,
                         compute_dtype=compute_dtype)

    # ---- mask (int8, kept at its broadcast shape) ----
    has_mask = mask is not None
    if has_mask:
        mask_arr = jnp.asarray(mask)
        while mask_arr.ndim < 4:
            mask_arr = mask_arr[None]
        nm, hm = mask_arr.shape[0], mask_arr.shape[1]
        assert nm in (1, N) and hm in (1, heads), "mask must broadcast to (N,H,q,k)"
        # (mask != 0) keeps masked_fill semantics even for float masks.
        mask_bool = jnp.broadcast_to(mask_arr != 0, (nm, hm, q_len, k_len))
        mask_i8 = mask_bool.astype(jnp.int8)
        Nm, Hm = nm, hm
    else:
        mask_bool = None
        mask_i8 = None
        Nm, Hm = 1, 1
    per_head_mask = Hm == heads
    per_batch_mask = Nm == N and N > 1

    # ---- tiling (generation-aware; footprint-checked, tkv shrinks first) ----
    tq = _pick_tile(q_len, tq_target, 8)
    tkv = _pick_tile(k_len, tkv_target, 128)
    budget = (vmem_limit * 3) // 4
    while (_attn_footprint(tq, tkv, embed_size, heads, head_dim, Hm, has_mask,
                           itemsize) > budget
           and tkv > 128 and _pick_tile(k_len, tkv // 2, 128) < tkv):
        tkv = _pick_tile(k_len, tkv // 2, 128)
    while (_attn_footprint(tq, tkv, embed_size, heads, head_dim, Hm, has_mask,
                           itemsize) > budget
           and tq > 8 and _pick_tile(q_len, tq // 2, 8) < tq):
        tq = _pick_tile(q_len, tq // 2, 8)
    # v7x has two TensorCores: try to expose >= 2 'parallel' programs.
    if N * (q_len // tq) < 2:
        half = _pick_tile(q_len, max(8, tq // 2), 8)
        if q_len // half >= 2:
            tq = half

    q_tiles, k_tiles = q_len // tq, k_len // tkv
    grid = (N, q_tiles, k_tiles)

    # Per-q-tile last active kv tile (reduced over batch/heads => conservative).
    # A q tile with no active kv tile falls back to the full sweep so it keeps
    # the baseline (-1e20 uniform) semantics of fully-masked rows.
    if has_mask:
        tile_active = mask_bool.any(axis=(0, 1)).reshape(
            q_tiles, tq, k_tiles, tkv).any(axis=(1, 3))        # (q_tiles, k_tiles)
        idx = jnp.arange(k_tiles, dtype=jnp.int32)
        last = jnp.max(jnp.where(tile_active, idx[None, :], -1), axis=1)
        kv_hi = jnp.where(last < 0, k_tiles - 1, last).astype(jnp.int32)
    else:
        kv_hi = jnp.full((q_tiles,), k_tiles - 1, jnp.int32)

    kernel = functools.partial(
        _attn_kernel, heads=heads, head_dim=head_dim,
        per_head_mask=per_head_mask, has_mask=has_mask,
        approx_recip=approx_recip, compute_dtype=compute_dtype)

    in_specs = []
    args = [kv_hi]
    if has_mask:
        in_specs.append(pl.BlockSpec(
            (pl.Squeezed(), Hm, tq, tkv),
            lambda n, qi, ki, kvh: ((n if per_batch_mask else 0), 0, qi,
                                    jnp.minimum(ki, kvh[qi]))))
        args.append(mask_i8)
    in_specs += [
        pl.BlockSpec((pl.Squeezed(), tq, embed_size),
                     lambda n, qi, ki, kvh: (n, qi, 0)),
        pl.BlockSpec((pl.Squeezed(), tkv, embed_size),
                     lambda n, qi, ki, kvh: (n, jnp.minimum(ki, kvh[qi]), 0)),
        pl.BlockSpec((pl.Squeezed(), tkv, embed_size),
                     lambda n, qi, ki, kvh: (n, jnp.minimum(ki, kvh[qi]), 0)),
    ]
    args += [q_p, k_p, v_p]

    context = pl.pallas_call(
        kernel,
        out_shape=jax.ShapeDtypeStruct((N, q_len, embed_size), compute_dtype),
        grid_spec=pltpu.PrefetchScalarGridSpec(
            num_scalar_prefetch=1,
            grid=grid,
            in_specs=in_specs,
            out_specs=pl.BlockSpec((pl.Squeezed(), tq, embed_size),
                                   lambda n, qi, ki, kvh: (n, qi, 0)),
            scratch_shapes=[
                pltpu.VMEM((heads, tq, 1), jnp.float32),         # running max
                pltpu.VMEM((heads, tq, 1), jnp.float32),         # running sum
                pltpu.VMEM((heads, tq, head_dim), jnp.float32),  # accumulator
            ],
        ),
        compiler_params=pltpu.CompilerParams(
            dimension_semantics=("parallel", "parallel", "arbitrary"),
            vmem_limit_bytes=vmem_limit),
    )(*args)

    # ---- fc_out: context is already (N, q_len, E) in compute_dtype ----
    M = N * q_len
    x2 = context.reshape(M, embed_size)
    w_out_t = w_out.T.astype(compute_dtype)            # (in, out): no in-kernel .T
    b2 = jnp.asarray(b_out).reshape(1, embed_size).astype(jnp.float32)

    tm = _pick_tile(M, 256, 8)
    tn = _pick_tile(embed_size, 256, 128)
    tk = _pick_tile(embed_size, 512, 128)

    # TODO(synk): for small E, fc_out could be fused into the attention
    # finalize (W_out resident in VMEM) to drop this context HBM round trip.
    out_flat = pl.pallas_call(
        _fc_kernel,
        out_shape=jax.ShapeDtypeStruct((M, embed_size), jnp.float32),
        grid_spec=pltpu.PrefetchScalarGridSpec(
            num_scalar_prefetch=0,
            grid=(M // tm, embed_size // tn, embed_size // tk),
            in_specs=[
                pl.BlockSpec((tm, tk), lambda i, j, k: (i, k)),
                pl.BlockSpec((tk, tn), lambda i, j, k: (k, j)),
                pl.BlockSpec((1, tn), lambda i, j, k: (0, j)),
            ],
            out_specs=pl.BlockSpec((tm, tn), lambda i, j, k: (i, j)),
            scratch_shapes=[pltpu.VMEM((tm, tn), jnp.float32)],
        ),
        compiler_params=pltpu.CompilerParams(
            dimension_semantics=("parallel", "parallel", "arbitrary"),
            vmem_limit_bytes=vmem_limit),
    )(x2, w_out_t, b2)

    return out_flat.reshape(N, q_len, embed_size)


# ----------------------------- reference (pure JAX) ---------------------------


def _reference(values, keys, query, mask, params, *, embed_size, heads):
    wq, wk, wv, w_out, b_out = params
    N, q_len, _ = query.shape
    hd = embed_size // heads
    v = values.reshape(N, -1, heads, hd) @ wv.T
    k = keys.reshape(N, -1, heads, hd) @ wk.T
    q = query.reshape(N, -1, heads, hd) @ wq.T
    energy = jnp.einsum("nqhd,nkhd->nhqk", q, k)
    if mask is not None:
        energy = jnp.where(mask == 0, jnp.float32(-1e20), energy)
    attn = jax.nn.softmax(energy / (embed_size ** 0.5), axis=3)
    out = jnp.einsum("nhql,nlhd->nqhd", attn, v).reshape(N, q_len, embed_size)
    return out @ w_out.T + jnp.asarray(b_out).reshape(1, embed_size)


# ----------------------------- main --------------------------------------------

if __name__ == "__main__":
    N, seq, embed_size, heads = 2, 8, 32, 4
    head_dim = embed_size // heads

    key = jax.random.PRNGKey(0)
    kv_, kk_, kq_, kwq, kwk, kwv, kwo, kbo = jax.random.split(key, 8)

    values = jax.random.normal(kv_, (N, seq, embed_size), jnp.float32)
    keys_in = jax.random.normal(kk_, (N, seq, embed_size), jnp.float32)
    query = jax.random.normal(kq_, (N, seq, embed_size), jnp.float32)

    # PyTorch Linear weight layout: (out_features, in_features).
    wq = jax.random.normal(kwq, (head_dim, head_dim), jnp.float32) * 0.1
    wk = jax.random.normal(kwk, (head_dim, head_dim), jnp.float32) * 0.1
    wv = jax.random.normal(kwv, (head_dim, head_dim), jnp.float32) * 0.1
    w_out = jax.random.normal(kwo, (embed_size, embed_size), jnp.float32) * 0.1
    b_out = jax.random.normal(kbo, (1, embed_size), jnp.float32) * 0.1
    params = (wq, wk, wv, w_out, b_out)

    # Causal mask kept at its broadcast shape (1, 1, q, k); ==0 means masked.
    causal = jnp.tril(jnp.ones((seq, seq), jnp.int32))[None, None]

    ref = _reference(values, keys_in, query, causal, params,
                     embed_size=embed_size, heads=heads)

    # Default path: bf16 MXU operands, f32 softmax/accumulation.
    out = jax.block_until_ready(
        self_attention(values, keys_in, query, causal, params,
                       embed_size=embed_size, heads=heads))
    assert out.shape == (N, seq, embed_size)
    assert jnp.allclose(out, ref, atol=8e-2, rtol=8e-2), \
        float(jnp.max(jnp.abs(out - ref)))

    # Explicit f32 path (exact reciprocal; tighter tolerance).
    out_f32 = jax.block_until_ready(
        self_attention(values, keys_in, query, causal, params,
                       embed_size=embed_size, heads=heads,
                       compute_dtype=jnp.float32))
    assert jnp.allclose(out_f32, ref, atol=5e-3, rtol=5e-3), \
        float(jnp.max(jnp.abs(out_f32 - ref)))

    # mask=None path.
    out_nm = jax.block_until_ready(
        self_attention(values, keys_in, query, None, params,
                       embed_size=embed_size, heads=heads))
    ref_nm = _reference(values, keys_in, query, None, params,
                        embed_size=embed_size, heads=heads)
    assert jnp.allclose(out_nm, ref_nm, atol=8e-2, rtol=8e-2), \
        float(jnp.max(jnp.abs(out_nm - ref_nm)))

    print("KERNEL_OK")
</pallas_src>

<mosaic_0001>
module attributes {stable_mosaic.version = 11 : i64} {
  func.func @_proj_kernel(%arg0: i32, %arg1: memref<64x8xbf16, #tpu.memory_space<vmem>>, %arg2: memref<8x8xbf16, #tpu.memory_space<vmem>>, %arg3: memref<64x8xbf16, #tpu.memory_space<vmem>>) attributes {dimension_semantics = [#tpu.dimension_semantics<parallel>], iteration_bounds = array<i64: 1>, scalar_prefetch = 0 : i64, scratch_operands = 0 : i64, tpu.core_type = #tpu.core_type<tc>, window_params = [{transform_indices = @transform_0, window_bounds = array<i64: 64, 8>}, {pipeline_mode = #tpu.pipeline_mode<synchronous>, transform_indices = @transform_1, window_bounds = array<i64: 8, 8>}, {transform_indices = @transform_2, window_bounds = array<i64: 64, 8>}]} {
    %c0 = arith.constant 0 : index
    %c0_0 = arith.constant 0 : index
    %0 = vector.load %arg1[%c0, %c0_0] : memref<64x8xbf16, #tpu.memory_space<vmem>>, vector<64x8xbf16>
    %c0_1 = arith.constant 0 : index
    %c0_2 = arith.constant 0 : index
    %1 = vector.load %arg2[%c0_1, %c0_2] : memref<8x8xbf16, #tpu.memory_space<vmem>>, vector<8x8xbf16>
    %cst = arith.constant dense<0.000000e+00> : vector<64x8xf32>
    %2 = tpu.matmul %0, %1, %cst {dimension_numbers = #tpu.dot_dimension_numbers<[1], [0], [0], [1], [0, 0, 1, 1], [], []>} : vector<64x8xbf16>, vector<8x8xbf16>, vector<64x8xf32> -> vector<64x8xf32>
    %3 = arith.truncf %2 : vector<64x8xf32> to vector<64x8xbf16>
    %c0_3 = arith.constant 0 : index
    %c0_4 = arith.constant 0 : index
    %4 = vector.load %arg3[%c0_3, %c0_4] : memref<64x8xbf16, #tpu.memory_space<vmem>>, vector<64x8xbf16>
    tpu.vector_store %arg3[%c0_3, %c0_4], %3 {strides = array<i32>} : memref<64x8xbf16, #tpu.memory_space<vmem>>, vector<64x8xbf16>,
    return
  }
  func.func @transform_0(%arg0: i32) -> (i32, i32) {
    %c0_i32 = arith.constant 0 : i32
    %c0_i32_0 = arith.constant 0 : i32
    return %arg0, %c0_i32 : i32, i32
  }
  func.func @transform_1(%arg0: i32) -> (i32, i32) {
    %c0_i32 = arith.constant 0 : i32
    %c0_i32_0 = arith.constant 0 : i32
    %c0_i32_1 = arith.constant 0 : i32
    return %c0_i32, %c0_i32_0 : i32, i32
  }
  func.func @transform_2(%arg0: i32) -> (i32, i32) {
    %c0_i32 = arith.constant 0 : i32
    %c0_i32_0 = arith.constant 0 : i32
    return %arg0, %c0_i32 : i32, i32
  }
}

</mosaic_0001>

<bundles_post_ra>
// kernel: tpu_custom_call.1
= control target key start
LH: loop header
LB: loop body
LE: loop exit
PB: predicated region body
PF: predicated region fallthrough
CT: control target
= control target key end

     0   :  { %vm54_vm0 = vcmask 1043456   ;;  %vm41_vm1 = vcmask 64512   ;;  %vm95_vm2 = vcmask 60416   ;;  %s197_s1 = inlined_call_operand.vmem [shape: bf16[8,8], index: 1, kind: input, shape index: {}]   ;;  %s198_s0 = inlined_call_operand.vmem [shape: bf16[64,8], index: 0, kind: input, shape index: {}]   ;;  %s199_s2 = inlined_call_operand.vmem [shape: bf16[64,8], index: 2, kind: output, shape index: {}]  }
   0x1   :  { %v20_v0 = vld [vmem:[%s197_s1] sm:$0xf]  ;;  %v129_v3 = vld [vmem:[%s198_s0 + $0x8] sm:$0xff]  ;;  %v130_v4 = vld [vmem:[%s198_s0 + $0x10] sm:$0xff] }
   0x2   :  { %v56_v1 = vsel %vm54_vm0, %v20_v0, 0  ;;  %v128_v2 = vld [vmem:[%s198_s0] sm:$0xff]  ;;  %v131_v5 = vld [vmem:[%s198_s0 + $0x18] sm:$0xff] }
   0x3   :  { %65 = vmatpush.bf16.msra.mxu0 %v56_v1  ;;  %132 = vmatpush.bf16.msra.mxu1 %v56_v1 }
   0x4   :  { %133 = vmatpush.bf16.msra.mxu2 %v56_v1  ;;  %134 = vmatpush.bf16.msra.mxu3 %v56_v1 }
   0x6   :  { %124 = vmatmul.msk.bf16.vlgmr.msra.gmra.mxu0 %vm41_vm1, %v128_v2  ;;  %125 = vmatmul.msk.bf16.vlgmr.msra.gmra.mxu1 %vm41_vm1, %v129_v3 }
   0x7   :  { %126 = vmatmul.msk.bf16.vlgmr.msra.gmra.mxu2 %vm41_vm1, %v130_v4  ;;  %127 = vmatmul.msk.bf16.vlgmr.msra.gmra.mxu3 %vm41_vm1, %v131_v5 }
  0x83   :  { %v67_v6 = vpop.f32.mrf.mxu0  ;;  %v72_v7 = vpop.f32.mrf.mxu1 }
  0x84   :  { %v87_v8 = vpack.c.bf16 %v67_v6, %v67_v6  ;;  %v89_v9 = vpack.c.bf16 %v72_v7, %v72_v7 }
  0x86   :  { %96 = vst.msk [vmem:[%s199_s2] sm:$0xf] %vm95_vm2, %v87_v8 }
  0x87   :  { %98 = vst.msk [vmem:[%s199_s2 + $0x8] sm:$0xf] %vm95_vm2, %v89_v9 }
  0x8a   :  { %v77_v10 = vpop.f32.mrf.mxu2  ;;  %v82_v11 = vpop.f32.mrf.mxu3 }
  0x8b   :  { %v91_v12 = vpack.c.bf16 %v77_v10, %v77_v10  ;;  %v93_v13 = vpack.c.bf16 %v82_v11, %v82_v11  ;;  %v69_v14 = vpop.f32.mrf.mxu0  ;;  %v74_v15 = vpop.f32.mrf.mxu1 }
  0x8c   :  { %v88_v16 = vpack.c.bf16 %v69_v14, %v69_v14  ;;  %v90_v17 = vpack.c.bf16 %v74_v15, %v74_v15 }
  0x8d   :  { %100 = vst.msk [vmem:[%s199_s2 + $0x10] sm:$0xf] %vm95_vm2, %v91_v12 }
  0x8e   :  { %102 = vst.msk [vmem:[%s199_s2 + $0x18] sm:$0xf] %vm95_vm2, %v93_v13 }
  0x8f   :  { %97 = vst.msk [vmem:[%s199_s2 + $0x4] sm:$0xf] %vm95_vm2, %v88_v16 }
  0x90   :  { %99 = vst.msk [vmem:[%s199_s2 + $0xc] sm:$0xf] %vm95_vm2, %v90_v17 }
  0x92   :  { %v79_v18 = vpop.f32.mrf.mxu2  ;;  %v84_v19 = vpop.f32.mrf.mxu3 }
  0x93   :  { %v92_v20 = vpack.c.bf16 %v79_v18, %v79_v18  ;;  %v94_v21 = vpack.c.bf16 %v84_v19, %v84_v19 }
  0x95   :  { %101 = vst.msk [vmem:[%s199_s2 + $0x14] sm:$0xf] %vm95_vm2, %v92_v20 }
  0x96   :  { %103 = vst.msk [vmem:[%s199_s2 + $0x1c] sm:$0xf] %vm95_vm2, %v94_v21 }

</bundles_post_ra>
